<compile_context>
chip_gen: v5e
topology: v5e:2x2
jax: 0.10.0
libtpu: 0.0.40
codegen_flags: <defaults>
</compile_context>

<pallas_src>
import functools

import jax
import jax.numpy as jnp
from jax.experimental import pallas as pl
from jax.experimental.pallas import tpu as pltpu


def _round_up(x, m):
    return ((x + m - 1) // m) * m


# -----------------------------------------------------------------------------
# Pallas kernel: fused actor+critic MLP chain, single lane-dense output
# -----------------------------------------------------------------------------
def bnn_actor_critic_kernel(*refs, output_dim):
    """refs = (x_ref, w_ref_0 .. w_ref_{L-1}, bias_ref, out_ref).

    Each w_ref is a fused (actor|critic) bf16 weight matrix, 128-aligned.
    bias_ref is an (8, W) f32 table, row i = bias of layer i (zero-padded).
    The last layer's output lanes are [alpha(0:od) | beta(od:2od) | v(2od) | pad];
    softplus(.)+1 applied only to the alpha/beta lanes (lane mask), v stays linear.
    """
    x_ref = refs[0]
    out_ref = refs[-1]
    bias_ref = refs[-2]
    w_refs = refs[1:-2]
    n_layers = len(w_refs)

    h = x_ref[...]  # (tile_b, d_pad) bf16
    for li, w_ref in enumerate(w_refs):
        width = w_ref.shape[1]
        bias = bias_ref[li:li + 1, 0:width]  # (1, width) f32
        z = jnp.dot(h, w_ref[...], preferred_element_type=jnp.float32) + bias
        if li < n_layers - 1:
            # hidden layer: ReLU on packed bf16 vregs (commutes with the downcast)
            h = jnp.maximum(z.astype(jnp.bfloat16), 0.0)
        else:
            # head: stable softplus(.)+1 on alpha/beta lanes, identity on v lane
            lane = jax.lax.broadcasted_iota(jnp.int32, (1, width), 1)  # (1, W)
            sp_mask = lane < (2 * output_dim)
            sp = jnp.maximum(z, 0.0) + jnp.log1p(jnp.exp(-jnp.abs(z)))
            out_ref[...] = jnp.where(sp_mask, sp + 1.0, z)


# -----------------------------------------------------------------------------
# Parameter construction (deterministic "one sample" of each BayesLinear layer)
# -----------------------------------------------------------------------------
def sample_bayes_linear(key, in_f, out_f, prior_sigma=0.1):
    """Return (W, b) with W shaped (in_f, out_f), b shaped (1, out_f), f32."""
    k_wmu, k_weps, k_bmu, k_beps = jax.random.split(key, 4)
    stdv = 1.0 / jnp.sqrt(jnp.float32(in_f))
    w_mu = jax.random.uniform(k_wmu, (in_f, out_f), jnp.float32, -stdv, stdv)
    b_mu = jax.random.uniform(k_bmu, (1, out_f), jnp.float32, -stdv, stdv)
    # log_sigma is initialized to log(prior_sigma) in torchbnn -> sigma == prior_sigma
    w = w_mu + prior_sigma * jax.random.normal(k_weps, (in_f, out_f), jnp.float32)
    b = b_mu + prior_sigma * jax.random.normal(k_beps, (1, out_f), jnp.float32)
    return w, b


def make_raw_params(key, d_in, architecture, output_dim):
    """Per-layer f32 parameters matching the PyTorch module layout."""
    n = len(architecture)
    keys = jax.random.split(key, 2 * n + 3)
    it = iter(keys)
    dims = [d_in] + list(architecture)
    actor = [sample_bayes_linear(next(it), dims[i], dims[i + 1]) for i in range(n)]
    alpha = sample_bayes_linear(next(it), architecture[-1], output_dim)
    beta = sample_bayes_linear(next(it), architecture[-1], output_dim)
    critic = [sample_bayes_linear(next(it), dims[i], dims[i + 1]) for i in range(n)]
    v = sample_bayes_linear(next(it), architecture[-1], 1)
    return dict(actor=actor, alpha=alpha, beta=beta, critic=critic, v=v)


def pack_params(raw, d_in, architecture, output_dim):
    """Fuse actor+critic layers into wide / block-diagonal bf16 weights and one
    f32 bias table. Returns (w_0, ..., w_L-1, bias_table)."""
    n = len(architecture)
    assert 2 * output_dim + 1 <= 128, "head packing assumes 2*output_dim+1 <= 128"
    d_pad = _round_up(d_in, 128)

    weights = []
    bias_rows = []

    # layer 1: both branches consume x -> concat along output dim
    aw, ab = raw["actor"][0]
    cw, cb = raw["critic"][0]
    h0 = architecture[0]
    w = jnp.zeros((d_pad, 2 * h0), jnp.float32)
    w = w.at[:d_in, :h0].set(aw).at[:d_in, h0:].set(cw)
    weights.append(w)
    bias_rows.append(jnp.concatenate([ab, cb], axis=1))

    # layers 2..n: block-diagonal (actor block, critic block)
    # TODO(synk): on v5e the structural-zero blocks are ~33% of MACs; a row-restack
    # variant reusing unfused weights could remove them (not worth it on v6e/v7x).
    for i in range(1, n):
        aw, ab = raw["actor"][i]
        cw, cb = raw["critic"][i]
        hi_in, hi_out = architecture[i - 1], architecture[i]
        w = jnp.zeros((2 * hi_in, 2 * hi_out), jnp.float32)
        w = w.at[:hi_in, :hi_out].set(aw).at[hi_in:, hi_out:].set(cw)
        weights.append(w)
        bias_rows.append(jnp.concatenate([ab, cb], axis=1))

    # head: rows 0..h-1 = actor hidden -> alpha|beta cols; rows h.. = critic -> v col
    h_last = architecture[-1]
    head_w = 128
    alw, alb = raw["alpha"]
    bew, beb = raw["beta"]
    vw, vb = raw["v"]
    w = jnp.zeros((2 * h_last, head_w), jnp.float32)
    w = w.at[:h_last, :output_dim].set(alw)
    w = w.at[:h_last, output_dim:2 * output_dim].set(bew)
    w = w.at[h_last:, 2 * output_dim:2 * output_dim + 1].set(vw)
    weights.append(w)
    hb = jnp.zeros((1, head_w), jnp.float32)
    hb = hb.at[:, :output_dim].set(alb)
    hb = hb.at[:, output_dim:2 * output_dim].set(beb)
    hb = hb.at[:, 2 * output_dim:2 * output_dim + 1].set(vb)
    bias_rows.append(hb)

    # one (8, max_width) f32 bias table, row i = layer i bias (zero-padded)
    max_width = _round_up(max(b.shape[1] for b in bias_rows), 128)
    n_rows = _round_up(len(bias_rows), 8)
    bias_tbl = jnp.zeros((n_rows, max_width), jnp.float32)
    for i, b in enumerate(bias_rows):
        bias_tbl = bias_tbl.at[i, :b.shape[1]].set(b[0])

    return tuple(w.astype(jnp.bfloat16) for w in weights) + (bias_tbl,)


# -----------------------------------------------------------------------------
# Wrapper: pad/flatten input, run the kernel, slice the lane-dense output
# -----------------------------------------------------------------------------
def bnn_actor_critic_forward(x, packed, output_dim=1):
    weights, bias_tbl = packed[:-1], packed[-1]
    B = x.shape[0]
    x_flat = x.reshape(B, -1)  # x.view(x.shape[0], -1)
    d_in = x_flat.shape[1]
    d_pad = weights[0].shape[0]
    head_w = weights[-1].shape[1]

    # Batch tiling:
    #   * tiles as large as possible (<=1024 rows): per-grid-step overhead dominates
    #   * once the batch is large, an EVEN number (>=2) of programs so v7x's two
    #     TensorCores both get work via the "parallel" batch axis
    #   * tile_b multiple of 16 (bf16 sublane packing); padding waste stays tiny
    MAX_TILE_B = 1024
    if B <= 256:
        n_tiles = 1
    else:
        n_tiles = max(2, -(-B // MAX_TILE_B))
        if n_tiles % 2:
            n_tiles += 1
    tile_b = max(16, _round_up(-(-B // n_tiles), 16))
    b_pad = n_tiles * tile_b

    # single fusable pad: batch -> b_pad rows, features -> d_pad lanes
    xp = jnp.pad(x_flat.astype(jnp.bfloat16),
                 ((0, b_pad - B), (0, d_pad - d_in)))

    grid = (n_tiles,)
    in_specs = [pl.BlockSpec((tile_b, d_pad), lambda i: (i, 0))]
    in_specs += [pl.BlockSpec(w.shape, lambda i: (0, 0)) for w in weights]
    in_specs += [pl.BlockSpec(bias_tbl.shape, lambda i: (0, 0))]
    out_spec = pl.BlockSpec((tile_b, head_w), lambda i: (i, 0))

    flops = 2 * b_pad * sum(int(w.shape[0]) * int(w.shape[1]) for w in weights)
    bytes_accessed = (
        int(xp.size) * 2
        + sum(int(w.size) * 2 for w in weights)
        + int(bias_tbl.size) * 4
        + b_pad * head_w * 4
    )
    cost = pl.CostEstimate(
        flops=flops,
        transcendentals=2 * b_pad * head_w,
        bytes_accessed=bytes_accessed,
    )

    out = pl.pallas_call(
        functools.partial(bnn_actor_critic_kernel, output_dim=output_dim),
        out_shape=jax.ShapeDtypeStruct((b_pad, head_w), jnp.float32),
        grid=grid,
        in_specs=in_specs,
        out_specs=out_spec,
        compiler_params=pltpu.CompilerParams(dimension_semantics=("parallel",)),
        cost_estimate=cost,
    )(xp, *weights, bias_tbl)

    alpha = out[:B, 0:output_dim]
    beta = out[:B, output_dim:2 * output_dim]
    v = out[:B, 2 * output_dim:2 * output_dim + 1]
    return (alpha, beta), v


# -----------------------------------------------------------------------------
# Pure-JAX reference (unfused, per-layer weights) for sanity checking
# -----------------------------------------------------------------------------
def reference_forward(x, raw, output_dim=1):
    B = x.shape[0]
    xf = x.reshape(B, -1).astype(jnp.float32)

    def dense(h, w, b, relu):
        y = jnp.dot(h.astype(jnp.bfloat16), w.astype(jnp.bfloat16),
                    preferred_element_type=jnp.float32) + b
        return jnp.maximum(y, 0.0) if relu else y

    ha = xf
    for w, b in raw["actor"]:
        ha = dense(ha, w, b, True)
    alw, alb = raw["alpha"]
    bew, beb = raw["beta"]
    alpha = jnp.logaddexp(dense(ha, alw, alb, False), 0.0) + 1.0
    beta = jnp.logaddexp(dense(ha, bew, beb, False), 0.0) + 1.0

    hc = xf
    for w, b in raw["critic"]:
        hc = dense(hc, w, b, True)
    vw, vb = raw["v"]
    v = dense(hc, vw, vb, False)
    return (alpha, beta), v


if __name__ == "__main__":
    STATE_STACK = 8
    INPUT_DIM = 11
    OUTPUT_DIM = 1
    ARCH = [256, 128, 64]
    BATCH = 8

    key = jax.random.PRNGKey(0)
    k_x, k_p = jax.random.split(key)

    # x mirrors the stacked-state observation: (B, state_stack, input_dim)
    x = jax.random.normal(k_x, (BATCH, STATE_STACK, INPUT_DIM), jnp.float32)

    d_in = STATE_STACK * INPUT_DIM
    raw = make_raw_params(k_p, d_in, ARCH, OUTPUT_DIM)
    packed = pack_params(raw, d_in, ARCH, OUTPUT_DIM)

    (alpha, beta), v = bnn_actor_critic_forward(x, packed, OUTPUT_DIM)
    jax.block_until_ready((alpha, beta, v))

    # correctness check vs pure-JAX (unfused) reference with identical bf16 casts
    (alpha_ref, beta_ref), v_ref = reference_forward(x, raw, OUTPUT_DIM)
    assert alpha.shape == (BATCH, OUTPUT_DIM) and beta.shape == (BATCH, OUTPUT_DIM)
    assert v.shape == (BATCH, 1)
    assert jnp.allclose(alpha, alpha_ref, atol=1e-3, rtol=1e-3)
    assert jnp.allclose(beta, beta_ref, atol=1e-3, rtol=1e-3)
    assert jnp.allclose(v, v_ref, atol=1e-3, rtol=1e-3)
    # alpha/beta of a Beta distribution must be > 1 after the +1
    assert bool(jnp.all(alpha > 1.0)) and bool(jnp.all(beta > 1.0))

    print("KERNEL_OK")
</pallas_src>

<mosaic_0001>
module attributes {stable_mosaic.version = 11 : i64} {
  func.func @bnn_actor_critic_kernel(%arg0: i32, %arg1: memref<16x128xbf16, #tpu.memory_space<vmem>>, %arg2: memref<128x512xbf16, #tpu.memory_space<vmem>>, %arg3: memref<512x256xbf16, #tpu.memory_space<vmem>>, %arg4: memref<256x128xbf16, #tpu.memory_space<vmem>>, %arg5: memref<128x128xbf16, #tpu.memory_space<vmem>>, %arg6: memref<8x512xf32, #tpu.memory_space<vmem>>, %arg7: memref<16x128xf32, #tpu.memory_space<vmem>>) attributes {dimension_semantics = [#tpu.dimension_semantics<parallel>], iteration_bounds = array<i64: 1>, scalar_prefetch = 0 : i64, scratch_operands = 0 : i64, tpu.core_type = #tpu.core_type<tc>, window_params = [{transform_indices = @transform_0, window_bounds = array<i64: 16, 128>}, {pipeline_mode = #tpu.pipeline_mode<synchronous>, transform_indices = @transform_1, window_bounds = array<i64: 128, 512>}, {pipeline_mode = #tpu.pipeline_mode<synchronous>, transform_indices = @transform_2, window_bounds = array<i64: 512, 256>}, {pipeline_mode = #tpu.pipeline_mode<synchronous>, transform_indices = @transform_3, window_bounds = array<i64: 256, 128>}, {pipeline_mode = #tpu.pipeline_mode<synchronous>, transform_indices = @transform_4, window_bounds = array<i64: 128, 128>}, {pipeline_mode = #tpu.pipeline_mode<synchronous>, transform_indices = @transform_5, window_bounds = array<i64: 8, 512>}, {transform_indices = @transform_6, window_bounds = array<i64: 16, 128>}]} {
    %c0 = arith.constant 0 : index
    %c0_0 = arith.constant 0 : index
    %0 = vector.load %arg1[%c0, %c0_0] : memref<16x128xbf16, #tpu.memory_space<vmem>>, vector<16x128xbf16>
    %c0_1 = arith.constant 0 : index
    %c0_2 = arith.constant 0 : index
    %1 = vector.load %arg6[%c0_1, %c0_2] : memref<8x512xf32, #tpu.memory_space<vmem>>, vector<1x512xf32>
    %c0_3 = arith.constant 0 : index
    %c0_4 = arith.constant 0 : index
    %2 = vector.load %arg2[%c0_3, %c0_4] : memref<128x512xbf16, #tpu.memory_space<vmem>>, vector<128x512xbf16>
    %cst = arith.constant dense<0.000000e+00> : vector<16x512xf32>
    %3 = tpu.matmul %0, %2, %cst {dimension_numbers = #tpu.dot_dimension_numbers<[1], [0], [0], [1], [0, 0, 1, 1], [], []>} : vector<16x128xbf16>, vector<128x512xbf16>, vector<16x512xf32> -> vector<16x512xf32>
    %4 = vector.broadcast %1 : vector<1x512xf32> to vector<16x512xf32>
    %5 = arith.addf %3, %4 : vector<16x512xf32>
    %6 = arith.truncf %5 : vector<16x512xf32> to vector<16x512xbf16>
    %cst_5 = arith.constant 0.000000e+00 : bf16
    %7 = vector.broadcast %cst_5 : bf16 to vector<16x512xbf16>
    %8 = arith.maximumf %6, %7 : vector<16x512xbf16>
    %c1 = arith.constant 1 : index
    %c0_6 = arith.constant 0 : index
    %9 = vector.load %arg6[%c1, %c0_6] : memref<8x512xf32, #tpu.memory_space<vmem>>, vector<1x256xf32>
    %c0_7 = arith.constant 0 : index
    %c0_8 = arith.constant 0 : index
    %10 = vector.load %arg3[%c0_7, %c0_8] : memref<512x256xbf16, #tpu.memory_space<vmem>>, vector<512x256xbf16>
    %cst_9 = arith.constant dense<0.000000e+00> : vector<16x256xf32>
    %11 = tpu.matmul %8, %10, %cst_9 {dimension_numbers = #tpu.dot_dimension_numbers<[1], [0], [0], [1], [0, 0, 1, 1], [], []>} : vector<16x512xbf16>, vector<512x256xbf16>, vector<16x256xf32> -> vector<16x256xf32>
    %12 = vector.broadcast %9 : vector<1x256xf32> to vector<16x256xf32>
    %13 = arith.addf %11, %12 : vector<16x256xf32>
    %14 = arith.truncf %13 : vector<16x256xf32> to vector<16x256xbf16>
    %cst_10 = arith.constant 0.000000e+00 : bf16
    %15 = vector.broadcast %cst_10 : bf16 to vector<16x256xbf16>
    %16 = arith.maximumf %14, %15 : vector<16x256xbf16>
    %c2 = arith.constant 2 : index
    %c0_11 = arith.constant 0 : index
    %17 = vector.load %arg6[%c2, %c0_11] : memref<8x512xf32, #tpu.memory_space<vmem>>, vector<1x128xf32>
    %c0_12 = arith.constant 0 : index
    %c0_13 = arith.constant 0 : index
    %18 = vector.load %arg4[%c0_12, %c0_13] : memref<256x128xbf16, #tpu.memory_space<vmem>>, vector<256x128xbf16>
    %cst_14 = arith.constant dense<0.000000e+00> : vector<16x128xf32>
    %19 = tpu.matmul %16, %18, %cst_14 {dimension_numbers = #tpu.dot_dimension_numbers<[1], [0], [0], [1], [0, 0, 1, 1], [], []>} : vector<16x256xbf16>, vector<256x128xbf16>, vector<16x128xf32> -> vector<16x128xf32>
    %20 = vector.broadcast %17 : vector<1x128xf32> to vector<16x128xf32>
    %21 = arith.addf %19, %20 : vector<16x128xf32>
    %22 = arith.truncf %21 : vector<16x128xf32> to vector<16x128xbf16>
    %cst_15 = arith.constant 0.000000e+00 : bf16
    %23 = vector.broadcast %cst_15 : bf16 to vector<16x128xbf16>
    %24 = arith.maximumf %22, %23 : vector<16x128xbf16>
    %c3 = arith.constant 3 : index
    %c0_16 = arith.constant 0 : index
    %25 = vector.load %arg6[%c3, %c0_16] : memref<8x512xf32, #tpu.memory_space<vmem>>, vector<1x128xf32>
    %c0_17 = arith.constant 0 : index
    %c0_18 = arith.constant 0 : index
    %26 = vector.load %arg5[%c0_17, %c0_18] : memref<128x128xbf16, #tpu.memory_space<vmem>>, vector<128x128xbf16>
    %cst_19 = arith.constant dense<0.000000e+00> : vector<16x128xf32>
    %27 = tpu.matmul %24, %26, %cst_19 {dimension_numbers = #tpu.dot_dimension_numbers<[1], [0], [0], [1], [0, 0, 1, 1], [], []>} : vector<16x128xbf16>, vector<128x128xbf16>, vector<16x128xf32> -> vector<16x128xf32>
    %28 = vector.broadcast %25 : vector<1x128xf32> to vector<16x128xf32>
    %29 = arith.addf %27, %28 : vector<16x128xf32>
    %30 = tpu.iota {dimensions = array<i32: 1>} : vector<1x128xi32>
    %c2_i32 = arith.constant 2 : i32
    %31 = vector.broadcast %c2_i32 : i32 to vector<1x128xi32>
    %32 = arith.cmpi slt, %30, %31 : vector<1x128xi32>
    %cst_20 = arith.constant 0.000000e+00 : f32
    %33 = vector.broadcast %cst_20 : f32 to vector<16x128xf32>
    %34 = arith.maximumf %29, %33 : vector<16x128xf32>
    %35 = math.absf %29 : vector<16x128xf32>
    %cst_21 = arith.constant 0.000000e+00 : f32
    %36 = vector.broadcast %cst_21 : f32 to vector<16x128xf32>
    %37 = arith.subf %36, %35 : vector<16x128xf32>
    %38 = math.exp %37 : vector<16x128xf32>
    %39 = math.log1p %38 : vector<16x128xf32>
    %40 = arith.addf %34, %39 : vector<16x128xf32>
    %cst_22 = arith.constant 1.000000e+00 : f32
    %41 = vector.broadcast %cst_22 : f32 to vector<16x128xf32>
    %42 = arith.addf %40, %41 : vector<16x128xf32>
    %43 = vector.shape_cast %32 : vector<1x128xi1> to vector<1x128xi1>
    %44 = vector.broadcast %43 : vector<1x128xi1> to vector<16x128xi1>
    %45 = arith.select %44, %42, %29 : vector<16x128xi1>, vector<16x128xf32>
    %c0_23 = arith.constant 0 : index
    %c0_24 = arith.constant 0 : index
    %46 = vector.load %arg7[%c0_23, %c0_24] : memref<16x128xf32, #tpu.memory_space<vmem>>, vector<16x128xf32>
    tpu.vector_store %arg7[%c0_23, %c0_24], %45 {strides = array<i32>} : memref<16x128xf32, #tpu.memory_space<vmem>>, vector<16x128xf32>,
    return
  }
  func.func @transform_0(%arg0: i32) -> (i32, i32) {
    %c0_i32 = arith.constant 0 : i32
    %c0_i32_0 = arith.constant 0 : i32
    return %arg0, %c0_i32 : i32, i32
  }
  func.func @transform_1(%arg0: i32) -> (i32, i32) {
    %c0_i32 = arith.constant 0 : i32
    %c0_i32_0 = arith.constant 0 : i32
    %c0_i32_1 = arith.constant 0 : i32
    return %c0_i32, %c0_i32_0 : i32, i32
  }
  func.func @transform_2(%arg0: i32) -> (i32, i32) {
    %c0_i32 = arith.constant 0 : i32
    %c0_i32_0 = arith.constant 0 : i32
    %c0_i32_1 = arith.constant 0 : i32
    return %c0_i32, %c0_i32_0 : i32, i32
  }
  func.func @transform_3(%arg0: i32) -> (i32, i32) {
    %c0_i32 = arith.constant 0 : i32
    %c0_i32_0 = arith.constant 0 : i32
    %c0_i32_1 = arith.constant 0 : i32
    return %c0_i32, %c0_i32_0 : i32, i32
  }
  func.func @transform_4(%arg0: i32) -> (i32, i32) {
    %c0_i32 = arith.constant 0 : i32
    %c0_i32_0 = arith.constant 0 : i32
    %c0_i32_1 = arith.constant 0 : i32
    return %c0_i32, %c0_i32_0 : i32, i32
  }
  func.func @transform_5(%arg0: i32) -> (i32, i32) {
    %c0_i32 = arith.constant 0 : i32
    %c0_i32_0 = arith.constant 0 : i32
    %c0_i32_1 = arith.constant 0 : i32
    return %c0_i32, %c0_i32_0 : i32, i32
  }
  func.func @transform_6(%arg0: i32) -> (i32, i32) {
    %c0_i32 = arith.constant 0 : i32
    %c0_i32_0 = arith.constant 0 : i32
    return %arg0, %c0_i32 : i32, i32
  }
}

</mosaic_0001>

<bundles_post_ra>
// kernel: tpu_custom_call.1
= control target key start
LH: loop header
LB: loop body
LE: loop exit
PB: predicated region body
PF: predicated region fallthrough
CT: control target
= control target key end

     0   :  { %11 = vsyncpa [#allocation3], 0  ;;  %s2108_s0 = inlined_call_operand.hbm [shape: bf16[16,128], index: 0, kind: input, shape index: {}]   ;;  %s2109_s1 = inlined_call_operand.hbm [shape: bf16[128,512], index: 1, kind: input, shape index: {}]   ;;  %s2110_s2 = inlined_call_operand.hbm [shape: bf16[512,256], index: 2, kind: input, shape index: {}]   ;;  %s2111_s3 = inlined_call_operand.hbm [shape: bf16[256,128], index: 3, kind: input, shape index: {}]   ;;  %s2112_s4 = inlined_call_operand.hbm [shape: bf16[128,128], index: 4, kind: input, shape index: {}]   ;;  %s2113_s5 = inlined_call_operand.hbm [shape: f32[8,512], index: 5, kind: input, shape index: {}]   ;;  %s2114_s6 = inlined_call_operand.hbm [shape: f32[16,128], index: 6, kind: output, shape index: {}]  }
   0x1   :  { %12 = vsyncpa [#allocation6], 0 }
   0x2   :  { %13 = vsyncpa [#allocation9], 0 }
   0x3   :  { %14 = vsyncpa [#allocation12], 0  ;;  %s33_s23 = sshll.u32 %s2109_s1, 4  ;;  %s34_s23 = int_to_ptr.hbm [resolvable:$true] %s33_s23 }
   0x4   :  { %15 = vsyncpa [#allocation4], 0  ;;  %s2031_s24 = smov [#allocation5]   ;;  %s2032_s26 = smov 256  }
   0x5   :  { %s35_s25 = sshll.u32 %s2031_s24, 4  ;;  %s2033_s27 = smov 16   ;;  %s36_s25 = int_to_ptr.vmem [resolvable:$true] %s35_s25 }
   0x6   :  { %41 = dma.hbm_to_vmem [thread:$0]  %s34_s23, 4096, %s36_s25, [#allocation6], %s2032_s26, %s2032_s26, %s2033_s27  }
   0x7   :  { %s59_s30 = sshll.u32 %s2111_s3, 4  ;;  %s2034_s7 = smov [#allocation8]   ;;  %s60_s30 = int_to_ptr.hbm [resolvable:$true] %s59_s30 }
   0x8   :  { %s61_s8 = sshll.u32 %s2034_s7, 4  ;;  %s20_s11 = sshll.u32 %s2108_s0, 4  ;;  %s62_s8 = int_to_ptr.vmem [resolvable:$true] %s61_s8  ;;  %s21_s11 = int_to_ptr.hbm [resolvable:$true] %s20_s11 }
   0x9   :  { %s2035_s1 = smov 64   ;;  %s2036_s12 = smov 4  }
   0xa   :  { %67 = dma.hbm_to_vmem [thread:$0]  %s60_s30, 2048, %s62_s8, [#allocation9], %s2035_s1, %s2035_s1, %s2036_s12  }
   0xb   :  { %s46_s15 = sshll.u32 %s2110_s2, 4  ;;  %s2037_s16 = smov [#allocation2]   ;;  %s47_s15 = int_to_ptr.hbm [resolvable:$true] %s46_s15 }
   0xc   :  { %s22_s17 = sshll.u32 %s2037_s16, 4  ;;  %s2038_s3 = smov [#allocation7]   ;;  %s23_s17 = int_to_ptr.vmem [resolvable:$true] %s22_s17 }
   0xd   :  { %28 = dma.hbm_to_vmem [thread:$0]  %s21_s11, 128, %s23_s17, [#allocation3], %s2035_s1, %s2035_s1, %s2036_s12  }
   0xe   :  { %s48_s18 = sshll.u32 %s2038_s3, 4  ;;  %s2039_s19 = smov 128   ;;  %s49_s18 = int_to_ptr.vmem [resolvable:$true] %s48_s18 }
   0xf   :  { %s2040_s20 = smov 8   ;;  %s72_s22 = sshll.u32 %s2112_s4, 4  ;;  %s73_s22 = int_to_ptr.hbm [resolvable:$true] %s72_s22 }
  0x10   :  { %54 = dma.hbm_to_vmem [thread:$0]  %s47_s15, 8192, %s49_s18, [#allocation6], %s2039_s19, %s2039_s19, %s2040_s20  }
  0x11   :  { %s2041_s2 = smov [#allocation10]   ;;  %s86_s26 = sshll.u32 %s2113_s5, 4  ;;  %s87_s26 = int_to_ptr.hbm [resolvable:$true] %s86_s26 }
  0x12   :  { %s74_s23 = sshll.u32 %s2041_s2, 4  ;;  %s2042_s27 = smov [#allocation11]   ;;  %s75_s23 = int_to_ptr.vmem [resolvable:$true] %s74_s23 }
  0x13   :  { %80 = dma.hbm_to_vmem [thread:$0]  %s73_s22, 1024, %s75_s23, [#allocation9], %s2035_s1, %s2035_s1, %s2036_s12  }
  0x14   :  { %s88_s28 = sshll.u32 %s2042_s27, 4  ;;  %s89_s28 = int_to_ptr.vmem [resolvable:$true] %s88_s28 }
  0x15   :  { %91 = dma.hbm_to_vmem [thread:$0]  %s87_s26, 512, %s89_s28, [#allocation12]  }
  0x16   :  { %2021 = dma.done.wait [#allocation3], 128  }
  0x17   :  { %2022 = vsyncadd [#allocation3], 4294967168 }
  0x18   :  { %2023 = dma.done.wait [#allocation6], 12288  }
  0x19   :  { %2024 = vsyncadd [#allocation6], 4294955008 }
  0x1a   :  { %2025 = dma.done.wait [#allocation9], 3072  }
  0x1b   :  { %2026 = vsyncadd [#allocation9], 4294964224 }
  0x1c   :  { %2027 = dma.done.wait [#allocation12], 512  }
  0x1d   :  { %2028 = vsyncadd [#allocation12], 4294966784  ;;  %v1345_v0 = vld [vmem:[#allocation5 + $0xe0] sm:$0xf]  ;;  %v1742_v1 = vld [vmem:[#allocation5 + $0xec] sm:$0xf0] }
  0x1e   :  { %v1740_v2 = vld [vmem:[#allocation5 + $0xe4] sm:$0xf]  ;;  %v1346_v3 = vor.u32 %v1742_v1, %v1345_v0  ;;  %v1347_v4 = vld [vmem:[#allocation5 + $0xf0] sm:$0xf0]  ;;  %v1353_v5 = vld [vmem:[#allocation5 + $0xe8] sm:$0xf] }
  0x1f   :  { %v1743_v6 = vld [vmem:[#allocation5 + $0xf4] sm:$0xf0]  ;;  %v1350_v7 = vor.u32 %v1740_v2, %v1347_v4  ;;  %v1741_v9 = vld [vmem:[#allocation5 + $0xec] sm:$0xf]  ;;  %v1355_v10 = vld [vmem:[#allocation5 + $0xf8] sm:$0xf0] }
  0x20   :  { %v1354_v8 = vor.u32 %v1743_v6, %v1353_v5  ;;  %v1329_v11 = vld [vmem:[#allocation5 + $0xc0] sm:$0xf]  ;;  %326 = vmatpush.bf16.msra.mxu0 %v1346_v3  ;;  %v1358_v12 = vor.u32 %v1741_v9, %v1355_v10  ;;  %v1738_v13 = vld [vmem:[#allocation5 + $0xcc] sm:$0xf0]  ;;  %v1736_v14 = vld [vmem:[#allocation5 + $0xc4] sm:$0xf] }
  0x21   :  { %v1331_v15 = vld [vmem:[#allocation5 + $0xd0] sm:$0xf0]  ;;  %340 = vmatpush.bf16.msra.mxu1 %v1350_v7  ;;  %v1330_v16 = vor.u32 %v1738_v13, %v1329_v11  ;;  %v1337_v18 = vld [vmem:[#allocation5 + $0xc8] sm:$0xf]  ;;  %v1739_v19 = vld [vmem:[#allocation5 + $0xd4] sm:$0xf0] }
  0x22   :  { %354 = vmatpush.bf16.msra.mxu2 %v1354_v8  ;;  %v1334_v17 = vor.u32 %v1736_v14, %v1331_v15  ;;  %v1737_v20 = vld [vmem:[#allocation5 + $0xcc] sm:$0xf]  ;;  %368 = vmatpush.bf16.msra.mxu3 %v1358_v12  ;;  %v1338_v21 = vor.u32 %v1739_v19, %v1337_v18  ;;  %v1339_v22 = vld [vmem:[#allocation5 + $0xd8] sm:$0xf0]  ;;  %v1313_v23 = vld [vmem:[#allocation5 + $0xa0] sm:$0xf] }
  0x23   :  { %v1734_v24 = vld [vmem:[#allocation5 + $0xac] sm:$0xf0]  ;;  %v1342_v25 = vor.u32 %v1737_v20, %v1339_v22  ;;  %v1732_v26 = vld [vmem:[#allocation5 + $0xa4] sm:$0xf]  ;;  %v1315_v27 = vld [vmem:[#allocation5 + $0xb0] sm:$0xf0] }
  0x24   :  { %v1321_v28 = vld [vmem:[#allocation5 + $0xa8] sm:$0xf]  ;;  %327 = vmatpush.bf16.msra.mxu0 %v1330_v16  ;;  %v1314_v29 = vor.u32 %v1734_v24, %v1313_v23  ;;  %v1735_v30 = vld [vmem:[#allocation5 + $0xb4] sm:$0xf0]  ;;  %v1733_v31 = vld [vmem:[#allocation5 + $0xac] sm:$0xf]  ;;  %v1318_v33 = vor.u32 %v1732_v26, %v1315_v27 }
  0x25   :  { %v1323_v32 = vld [vmem:[#allocation5 + $0xb8] sm:$0xf0]  ;;  %341 = vmatpush.bf16.msra.mxu1 %v1334_v17  ;;  %v1322_v34 = vor.u32 %v1735_v30, %v1321_v28  ;;  %v1297_v35 = vld [vmem:[#allocation5 + $0x80] sm:$0xf]  ;;  %v1730_v36 = vld [vmem:[#allocation5 + $0x8c] sm:$0xf0] }
  0x26   :  { %355 = vmatpush.bf16.msra.mxu2 %v1338_v21  ;;  %v1728_v37 = vld [vmem:[#allocation5 + $0x84] sm:$0xf]  ;;  %369 = vmatpush.bf16.msra.mxu3 %v1342_v25  ;;  %v1326_v38 = vor.u32 %v1733_v31, %v1323_v32  ;;  %v1299_v39 = vld [vmem:[#allocation5 + $0x90] sm:$0xf0]  ;;  %v1305_v40 = vld [vmem:[#allocation5 + $0x88] sm:$0xf]  ;;  %v1298_v44 = vor.u32 %v1730_v36, %v1297_v35 }
  0x27   :  { %v1731_v41 = vld [vmem:[#allocation5 + $0x94] sm:$0xf0]  ;;  %v1729_v42 = vld [vmem:[#allocation5 + $0x8c] sm:$0xf]  ;;  %v1307_v43 = vld [vmem:[#allocation5 + $0x98] sm:$0xf0]  ;;  %v1302_v45 = vor.u32 %v1728_v37, %v1299_v39 }
  0x28   :  { %328 = vmatpush.bf16.msra.mxu0 %v1314_v29  ;;  %v1306_v46 = vor.u32 %v1731_v41, %v1305_v40  ;;  %v1281_v47 = vld [vmem:[#allocation5 + $0x60] sm:$0xf]  ;;  %v1726_v48 = vld [vmem:[#allocation5 + $0x6c] sm:$0xf0]  ;;  %v1724_v49 = vld [vmem:[#allocation5 + $0x64] sm:$0xf]  ;;  %v1310_v50 = vor.u32 %v1729_v42, %v1307_v43 }
  0x29   :  { %342 = vmatpush.bf16.msra.mxu1 %v1318_v33  ;;  %v1283_v51 = vld [vmem:[#allocation5 + $0x70] sm:$0xf0]  ;;  %v1289_v52 = vld [vmem:[#allocation5 + $0x68] sm:$0xf]  ;;  %v1727_v53 = vld [vmem:[#allocation5 + $0x74] sm:$0xf0]  ;;  %v1282_v56 = vor.u32 %v1726_v48, %v1281_v47 }
  0x2a   :  { %356 = vmatpush.bf16.msra.mxu2 %v1322_v34  ;;  %370 = vmatpush.bf16.msra.mxu3 %v1326_v38  ;;  %v1725_v54 = vld [vmem:[#allocation5 + $0x6c] sm:$0xf]  ;;  %v1291_v55 = vld [vmem:[#allocation5 + $0x78] sm:$0xf0]  ;;  %v1286_v57 = vor.u32 %v1724_v49, %v1283_v51  ;;  %v1290_v58 = vor.u32 %v1727_v53, %v1289_v52  ;;  %v1265_v59 = vld [vmem:[#allocation5 + $0x40] sm:$0xf] }
  0x2b   :  { %v1722_v60 = vld [vmem:[#allocation5 + $0x4c] sm:$0xf0]  ;;  %v1720_v61 = vld [vmem:[#allocation5 + $0x44] sm:$0xf]  ;;  %v1294_v62 = vor.u32 %v1725_v54, %v1291_v55  ;;  %v1267_v63 = vld [vmem:[#allocation5 + $0x50] sm:$0xf0] }
  0x2c   :  { %329 = vmatpush.bf16.msra.mxu0 %v1298_v44  ;;  %v1273_v0 = vld [vmem:[#allocation5 + $0x48] sm:$0xf]  ;;  %v1723_v1 = vld [vmem:[#allocation5 + $0x54] sm:$0xf0]  ;;  %v1721_v2 = vld [vmem:[#allocation5 + $0x4c] sm:$0xf]  ;;  %v1266_v4 = vor.u32 %v1722_v60, %v1265_v59  ;;  %v1270_v5 = vor.u32 %v1720_v61, %v1267_v63 }
  0x2d   :  { %343 = vmatpush.bf16.msra.mxu1 %v1302_v45  ;;  %v1275_v3 = vld [vmem:[#allocation5 + $0x58] sm:$0xf0]  ;;  %v1274_v6 = vor.u32 %v1723_v1, %v1273_v0  ;;  %v1249_v7 = vld [vmem:[#allocation5 + $0x20] sm:$0xf]  ;;  %v1718_v8 = vld [vmem:[#allocation5 + $0x2c] sm:$0xf0] }
  0x2e   :  { %357 = vmatpush.bf16.msra.mxu2 %v1306_v46  ;;  %371 = vmatpush.bf16.msra.mxu3 %v1310_v50  ;;  %v1716_v9 = vld [vmem:[#allocation5 + $0x24] sm:$0xf]  ;;  %v1278_v10 = vor.u32 %v1721_v2, %v1275_v3  ;;  %v1251_v11 = vld [vmem:[#allocation5 + $0x30] sm:$0xf0]  ;;  %v1257_v12 = vld [vmem:[#allocation5 + $0x28] sm:$0xf]  ;;  %v1250_v16 = vor.u32 %v1718_v8, %v1249_v7 }
  0x2f   :  { %v1719_v13 = vld [vmem:[#allocation5 + $0x34] sm:$0xf0]  ;;  %v1717_v14 = vld [vmem:[#allocation5 + $0x2c] sm:$0xf]  ;;  %v1259_v15 = vld [vmem:[#allocation5 + $0x38] sm:$0xf0]  ;;  %v1254_v18 = vor.u32 %v1716_v9, %v1251_v11 }
  0x30   :  { %330 = vmatpush.bf16.msra.mxu0 %v1282_v56  ;;  %v1233_v17 = vld [vmem:[#allocation5] sm:$0xf]  ;;  %v1258_v19 = vor.u32 %v1719_v13, %v1257_v12  ;;  %v1714_v20 = vld [vmem:[#allocation5 + $0xc] sm:$0xf0]  ;;  %v1712_v21 = vld [vmem:[#allocation5 + $0x4] sm:$0xf]  ;;  %v1262_v23 = vor.u32 %v1717_v14, %v1259_v15 }
  0x31   :  { %344 = vmatpush.bf16.msra.mxu1 %v1286_v57  ;;  %v1235_v22 = vld [vmem:[#allocation5 + $0x10] sm:$0xf0]  ;;  %v1241_v24 = vld [vmem:[#allocation5 + $0x8] sm:$0xf]  ;;  %v1715_v25 = vld [vmem:[#allocation5 + $0x14] sm:$0xf0]  ;;  %v1234_v30 = vor.u32 %v1714_v20, %v1233_v17 }
  0x32   :  { %358 = vmatpush.bf16.msra.mxu2 %v1290_v58  ;;  %372 = vmatpush.bf16.msra.mxu3 %v1294_v62  ;;  %v1713_v26 = vld [vmem:[#allocation5 + $0xc] sm:$0xf]  ;;  %v1243_v27 = vld [vmem:[#allocation5 + $0x18] sm:$0xf0]  ;;  %v1417_v28 = vld [vmem:[#allocation7 + $0x70] sm:$0xf]  ;;  %v1238_v33 = vor.u32 %v1712_v21, %v1235_v22  ;;  %v1242_v34 = vor.u32 %v1715_v25, %v1241_v24 }
  0x33   :  { %v1759_v29 = vld [vmem:[#allocation7 + $0x74] sm:$0xf0]  ;;  %v1481_v31 = vld [vmem:[#allocation7 + $0xf0] sm:$0xf]  ;;  %v1246_v36 = vor.u32 %v1713_v26, %v1243_v27  ;;  %v1409_v38 = vld [vmem:[#allocation7 + $0x60] sm:$0xf] }
  0x34   :  { %331 = vmatpush.bf16.msra.mxu0 %v1266_v4  ;;  %v1775_v32 = vld [vmem:[#allocation7 + $0xf4] sm:$0xf0]  ;;  %v1418_v37 = vor.u32 %v1759_v29, %v1417_v28  ;;  %v1545_v39 = vld [vmem:[#allocation7 + $0x170] sm:$0xf]  ;;  %v1757_v42 = vld [vmem:[#allocation7 + $0x64] sm:$0xf0] }
  0x35   :  { %345 = vmatpush.bf16.msra.mxu1 %v1270_v5  ;;  %v1711_v35 = vld [vmem:[#allocation2] sm:$0xff]  ;;  %v1482_v41 = vor.u32 %v1775_v32, %v1481_v31  ;;  %v1609_v43 = vld [vmem:[#allocation7 + $0x1f0] sm:$0xf]  ;;  %v1473_v45 = vld [vmem:[#allocation7 + $0xe0] sm:$0xf]  ;;  %v1410_v48 = vor.u32 %v1757_v42, %v1409_v38  ;;  %s2043_s4 = smov [#allocation13]  }
  0x36   :  { %359 = vmatpush.bf16.msra.mxu2 %v1274_v6  ;;  %373 = vmatpush.bf16.msra.mxu3 %v1278_v10  ;;  %v1791_v40 = vld [vmem:[#allocation7 + $0x174] sm:$0xf0]  ;;  %v1773_v46 = vld [vmem:[#allocation7 + $0xe4] sm:$0xf0]  ;;  %v1401_v50 = vld [vmem:[#allocation7 + $0x50] sm:$0xf] }
  0x37   :  { %v1807_v44 = vld [vmem:[#allocation7 + $0x1f4] sm:$0xf0]  ;;  %v1546_v47 = vor.u32 %v1791_v40, %v1545_v39  ;;  %v1537_v51 = vld [vmem:[#allocation7 + $0x160] sm:$0xf]  ;;  %v1789_v52 = vld [vmem:[#allocation7 + $0x164] sm:$0xf0]  ;;  %v1474_v53 = vor.u32 %v1773_v46, %v1473_v45 }
  0x38   :  { %332 = vmatpush.bf16.msra.mxu0 %v1250_v16  ;;  %v1610_v49 = vor.u32 %v1807_v44, %v1609_v43  ;;  %v1755_v54 = vld [vmem:[#allocation7 + $0x54] sm:$0xf0]  ;;  %v1601_v55 = vld [vmem:[#allocation7 + $0x1e0] sm:$0xf]  ;;  %v1805_v56 = vld [vmem:[#allocation7 + $0x1e4] sm:$0xf0]  ;;  %v1538_v59 = vor.u32 %v1789_v52, %v1537_v51 }
  0x39   :  { %346 = vmatpush.bf16.msra.mxu1 %v1254_v18  ;;  %v1465_v57 = vld [vmem:[#allocation7 + $0xd0] sm:$0xf]  ;;  %v1771_v58 = vld [vmem:[#allocation7 + $0xd4] sm:$0xf0]  ;;  %v1402_v60 = vor.u32 %v1755_v54, %v1401_v50  ;;  %v1602_v61 = vor.u32 %v1805_v56, %v1601_v55  ;;  %v1393_v62 = vld [vmem:[#allocation7 + $0x40] sm:$0xf] }
  0x3a   :  { %360 = vmatpush.bf16.msra.mxu2 %v1258_v19  ;;  %374 = vmatpush.bf16.msra.mxu3 %v1262_v23  ;;  %v1529_v63 = vld [vmem:[#allocation7 + $0x150] sm:$0xf]  ;;  %v1787_v0 = vld [vmem:[#allocation7 + $0x154] sm:$0xf0]  ;;  %v1466_v1 = vor.u32 %v1771_v58, %v1465_v57  ;;  %v1753_v2 = vld [vmem:[#allocation7 + $0x44] sm:$0xf0] }
  0x3b   :  { %v1593_v3 = vld [vmem:[#allocation7 + $0x1d0] sm:$0xf]  ;;  %v1803_v4 = vld [vmem:[#allocation7 + $0x1d4] sm:$0xf0]  ;;  %v1457_v5 = vld [vmem:[#allocation7 + $0xc0] sm:$0xf]  ;;  %v1530_v7 = vor.u32 %v1787_v0, %v1529_v63  ;;  %v1394_v8 = vor.u32 %v1753_v2, %v1393_v62 }
  0x3c   :  { %333 = vmatpush.bf16.msra.mxu0 %v1234_v30  ;;  %v1769_v6 = vld [vmem:[#allocation7 + $0xc4] sm:$0xf0]  ;;  %v1594_v9 = vor.u32 %v1803_v4, %v1593_v3  ;;  %v1385_v10 = vld [vmem:[#allocation7 + $0x30] sm:$0xf]  ;;  %v1521_v11 = vld [vmem:[#allocation7 + $0x140] sm:$0xf] }
  0x3d   :  { %347 = vmatpush.bf16.msra.mxu1 %v1238_v33  ;;  %v1785_v12 = vld [vmem:[#allocation7 + $0x144] sm:$0xf0]  ;;  %v1458_v13 = vor.u32 %v1769_v6, %v1457_v5  ;;  %v1751_v14 = vld [vmem:[#allocation7 + $0x34] sm:$0xf0]  ;;  %v1585_v15 = vld [vmem:[#allocation7 + $0x1c0] sm:$0xf] }
  0x3e   :  { %361 = vmatpush.bf16.msra.mxu2 %v1242_v34  ;;  %375 = vmatpush.bf16.msra.mxu3 %v1246_v36  ;;  %v1801_v16 = vld [vmem:[#allocation7 + $0x1c4] sm:$0xf0]  ;;  %v1449_v17 = vld [vmem:[#allocation7 + $0xb0] sm:$0xf]  ;;  %v1767_v18 = vld [vmem:[#allocation7 + $0xb4] sm:$0xf0]  ;;  %v1522_v19 = vor.u32 %v1785_v12, %v1521_v11  ;;  %v1386_v20 = vor.u32 %v1751_v14, %v1385_v10 }
  0x3f   :  { %334 = vmatmul.bf16.vlgmr.msra.gmra.mxu0 %v1711_v35  ;;  %v1586_v21 = vor.u32 %v1801_v16, %v1585_v15  ;;  %v1377_v22 = vld [vmem:[#allocation7 + $0x20] sm:$0xf]  ;;  %v1513_v23 = vld [vmem:[#allocation7 + $0x130] sm:$0xf]  ;;  %v1783_v24 = vld [vmem:[#allocation7 + $0x134] sm:$0xf0]  ;;  %v1450_v25 = vor.u32 %v1767_v18, %v1449_v17 }
  0x40   :  { %797 = vmatpush.bf16.msrb.mxu0 %v1418_v37  ;;  %348 = vmatmul.bf16.vlgmr.msra.gmra.mxu1 %v1711_v35  ;;  %v1749_v26 = vld [vmem:[#allocation7 + $0x24] sm:$0xf0]  ;;  %v1577_v27 = vld [vmem:[#allocation7 + $0x1b0] sm:$0xf]  ;;  %v1799_v28 = vld [vmem:[#allocation7 + $0x1b4] sm:$0xf0]  ;;  %v1514_v31 = vor.u32 %v1783_v24, %v1513_v23 }
  0x41   :  { %811 = vmatpush.bf16.msrb.mxu1 %v1482_v41  ;;  %362 = vmatmul.bf16.vlgmr.msra.gmra.mxu2 %v1711_v35  ;;  %v1441_v29 = vld [vmem:[#allocation7 + $0xa0] sm:$0xf]  ;;  %v1765_v30 = vld [vmem:[#allocation7 + $0xa4] sm:$0xf0]  ;;  %v1378_v32 = vor.u32 %v1749_v26, %v1377_v22  ;;  %v1578_v33 = vor.u32 %v1799_v28, %v1577_v27  ;;  %v1369_v34 = vld [vmem:[#allocation7 + $0x10] sm:$0xf] }
  0x42   :  { %376 = vmatmul.bf16.vlgmr.msra.gmra.mxu3 %v1711_v35  ;;  %825 = vmatpush.bf16.msrb.mxu2 %v1546_v47  ;;  %v1505_v35 = vld [vmem:[#allocation7 + $0x120] sm:$0xf]  ;;  %v1781_v36 = vld [vmem:[#allocation7 + $0x124] sm:$0xf0]  ;;  %v1442_v37 = vor.u32 %v1765_v30, %v1441_v29  ;;  %v1747_v38 = vld [vmem:[#allocation7 + $0x14] sm:$0xf0] }
  0x43   :  { %839 = vmatpush.bf16.msrb.mxu3 %v1610_v49  ;;  %v1569_v39 = vld [vmem:[#allocation7 + $0x1a0] sm:$0xf]  ;;  %v1797_v40 = vld [vmem:[#allocation7 + $0x1a4] sm:$0xf0]  ;;  %v1433_v41 = vld [vmem:[#allocation7 + $0x90] sm:$0xf]  ;;  %v1506_v43 = vor.u32 %v1781_v36, %v1505_v35  ;;  %v1370_v44 = vor.u32 %v1747_v38, %v1369_v34 }
  0x44   :  { %798 = vmatpush.bf16.msrb.mxu0 %v1410_v48  ;;  %v1763_v42 = vld [vmem:[#allocation7 + $0x94] sm:$0xf0]  ;;  %v1570_v45 = vor.u32 %v1797_v40, %v1569_v39  ;;  %v1361_v47 = vld [vmem:[#allocation7] sm:$0xf]  ;;  %v1745_v48 = vld [vmem:[#allocation7 + $0x4] sm:$0xf0] }
  0x45   :  { %812 = vmatpush.bf16.msrb.mxu1 %v1474_v53  ;;  %v1434_v46 = vor.u32 %v1763_v42, %v1433_v41  ;;  %v1425_v49 = vld [vmem:[#allocation7 + $0x80] sm:$0xf]  ;;  %v1761_v50 = vld [vmem:[#allocation7 + $0x84] sm:$0xf0]  ;;  %v1362_v51 = vor.u32 %v1745_v48, %v1361_v47  ;;  %v1758_v53 = vld [vmem:[#allocation7 + $0x74] sm:$0xf] }
  0x46   :  { %826 = vmatpush.bf16.msrb.mxu2 %v1538_v59  ;;  %v1426_v52 = vor.u32 %v1761_v50, %v1425_v49  ;;  %v1419_v54 = vld [vmem:[#allocation7 + $0x78] sm:$0xf0]  ;;  %v1774_v55 = vld [vmem:[#allocation7 + $0xf4] sm:$0xf]  ;;  %v1497_v58 = vld [vmem:[#allocation7 + $0x110] sm:$0xf] }
  0x47   :  { %840 = vmatpush.bf16.msrb.mxu3 %v1602_v61  ;;  %v1422_v56 = vor.u32 %v1758_v53, %v1419_v54  ;;  %v1483_v57 = vld [vmem:[#allocation7 + $0xf8] sm:$0xf0]  ;;  %v1779_v59 = vld [vmem:[#allocation7 + $0x114] sm:$0xf0]  ;;  %v1561_v62 = vld [vmem:[#allocation7 + $0x190] sm:$0xf] }
  0x48   :  { %799 = vmatpush.bf16.msrb.mxu0 %v1402_v60  ;;  %v1486_v60 = vor.u32 %v1774_v55, %v1483_v57  ;;  %v1498_v61 = vor.u32 %v1779_v59, %v1497_v58  ;;  %v1795_v63 = vld [vmem:[#allocation7 + $0x194] sm:$0xf0]  ;;  %v1411_v2 = vld [vmem:[#allocation7 + $0x68] sm:$0xf0]  ;;  %v1772_v4 = vld [vmem:[#allocation7 + $0xe4] sm:$0xf] }
  0x49   :  { %813 = vmatpush.bf16.msrb.mxu1 %v1466_v1  ;;  %v1562_v0 = vor.u32 %v1795_v63, %v1561_v62  ;;  %v1756_v1 = vld [vmem:[#allocation7 + $0x64] sm:$0xf]  ;;  %v1475_v5 = vld [vmem:[#allocation7 + $0xe8] sm:$0xf0]  ;;  %v1489_v6 = vld [vmem:[#allocation7 + $0x100] sm:$0xf] }
  0x4a   :  { %827 = vmatpush.bf16.msrb.mxu2 %v1530_v7  ;;  %v1414_v3 = vor.u32 %v1756_v1, %v1411_v2  ;;  %v1478_v7 = vor.u32 %v1772_v4, %v1475_v5  ;;  %v1793_v10 = vld [vmem:[#allocation7 + $0x184] sm:$0xf0]  ;;  %v1547_v14 = vld [vmem:[#allocation7 + $0x178] sm:$0xf0]  ;;  %v1806_v16 = vld [vmem:[#allocation7 + $0x1f4] sm:$0xf] }
  0x4b   :  { %841 = vmatpush.bf16.msrb.mxu3 %v1594_v9  ;;  %v1553_v9 = vld [vmem:[#allocation7 + $0x180] sm:$0xf]  ;;  %v1611_v17 = vld [vmem:[#allocation7 + $0x1f8] sm:$0xf0]  ;;  %v1754_v18 = vld [vmem:[#allocation7 + $0x54] sm:$0xf] }
  0x4c   :  { %800 = vmatpush.bf16.msrb.mxu0 %v1394_v8  ;;  %v1777_v8 = vld [vmem:[#allocation7 + $0x104] sm:$0xf0]  ;;  %v1554_v12 = vor.u32 %v1793_v10, %v1553_v9  ;;  %v1467_v22 = vld [vmem:[#allocation7 + $0xd8] sm:$0xf0]  ;;  %v1539_v26 = vld [vmem:[#allocation7 + $0x168] sm:$0xf0] }
  0x4d   :  { %814 = vmatpush.bf16.msrb.mxu1 %v1458_v13  ;;  %v1490_v11 = vor.u32 %v1777_v8, %v1489_v6  ;;  %v1790_v13 = vld [vmem:[#allocation7 + $0x174] sm:$0xf]  ;;  %v1804_v28 = vld [vmem:[#allocation7 + $0x1e4] sm:$0xf]  ;;  %v1603_v29 = vld [vmem:[#allocation7 + $0x1e8] sm:$0xf0] }
  0x4e   :  { %828 = vmatpush.bf16.msrb.mxu2 %v1522_v19  ;;  %v1550_v15 = vor.u32 %v1790_v13, %v1547_v14  ;;  %v1614_v19 = vor.u32 %v1806_v16, %v1611_v17  ;;  %v1606_v30 = vor.u32 %v1804_v28, %v1603_v29  ;;  %v1459_v35 = vld [vmem:[#allocation7 + $0xc8] sm:$0xf0]  ;;  %v1531_v38 = vld [vmem:[#allocation7 + $0x158] sm:$0xf0]  ;;  %v1802_v39 = vld [vmem:[#allocation7 + $0x1d4] sm:$0xf] }
  0x4f   :  { %842 = vmatpush.bf16.msrb.mxu3 %v1586_v21  ;;  %v1770_v21 = vld [vmem:[#allocation7 + $0xd4] sm:$0xf]  ;;  %v1595_v41 = vld [vmem:[#allocation7 + $0x1d8] sm:$0xf0]  ;;  %v1784_v49 = vld [vmem:[#allocation7 + $0x144] sm:$0xf] }
  0x50   :  { %801 = vmatpush.bf16.msrb.mxu0 %v1386_v20  ;;  %v1403_v20 = vld [vmem:[#allocation7 + $0x58] sm:$0xf0]  ;;  %v1470_v24 = vor.u32 %v1770_v21, %v1467_v22  ;;  %v1598_v42 = vor.u32 %v1802_v39, %v1595_v41  ;;  %v1523_v50 = vld [vmem:[#allocation7 + $0x148] sm:$0xf0]  ;;  %v1748_v55 = vld [vmem:[#allocation7 + $0x24] sm:$0xf] }
  0x51   :  { %815 = vmatpush.bf16.msrb.mxu1 %v1450_v25  ;;  %v1406_v23 = vor.u32 %v1754_v18, %v1403_v20  ;;  %v1788_v25 = vld [vmem:[#allocation7 + $0x164] sm:$0xf]  ;;  %v1451_v47 = vld [vmem:[#allocation7 + $0xb8] sm:$0xf0]  ;;  %v1587_v53 = vld [vmem:[#allocation7 + $0x1c8] sm:$0xf0] }
  0x52   :  { %829 = vmatpush.bf16.msrb.mxu2 %v1514_v31  ;;  %v1542_v27 = vor.u32 %v1788_v25, %v1539_v26  ;;  %v1752_v31 = vld [vmem:[#allocation7 + $0x44] sm:$0xf]  ;;  %v1443_v59 = vld [vmem:[#allocation7 + $0xa8] sm:$0xf0]  ;;  %v1515_v62 = vld [vmem:[#allocation7 + $0x138] sm:$0xf0] }
  0x53   :  { %843 = vmatpush.bf16.msrb.mxu3 %v1578_v33  ;;  %v1768_v33 = vld [vmem:[#allocation7 + $0xc4] sm:$0xf]  ;;  %v1798_v63 = vld [vmem:[#allocation7 + $0x1b4] sm:$0xf]  ;;  %v1579_v1 = vld [vmem:[#allocation7 + $0x1b8] sm:$0xf0] }
  0x54   :  { %802 = vmatpush.bf16.msrb.mxu0 %v1378_v32  ;;  %v1395_v32 = vld [vmem:[#allocation7 + $0x48] sm:$0xf0]  ;;  %v1462_v36 = vor.u32 %v1768_v33, %v1459_v35  ;;  %v1764_v57 = vld [vmem:[#allocation7 + $0xa4] sm:$0xf]  ;;  %v1582_v2 = vor.u32 %v1798_v63, %v1579_v1  ;;  %v1371_v4 = vld [vmem:[#allocation7 + $0x18] sm:$0xf0] }
  0x55   :  { %816 = vmatpush.bf16.msrb.mxu1 %v1442_v37  ;;  %v1398_v34 = vor.u32 %v1752_v31, %v1395_v32  ;;  %v1786_v37 = vld [vmem:[#allocation7 + $0x154] sm:$0xf]  ;;  %v1780_v8 = vld [vmem:[#allocation7 + $0x124] sm:$0xf]  ;;  %v1507_v9 = vld [vmem:[#allocation7 + $0x128] sm:$0xf0] }
  0x56   :  { %830 = vmatpush.bf16.msrb.mxu2 %v1506_v43  ;;  %v1534_v40 = vor.u32 %v1786_v37, %v1531_v38  ;;  %v1750_v43 = vld [vmem:[#allocation7 + $0x34] sm:$0xf]  ;;  %v1571_v13 = vld [vmem:[#allocation7 + $0x1a8] sm:$0xf0]  ;;  %v1744_v14 = vld [vmem:[#allocation7 + $0x4] sm:$0xf] }
  0x57   :  { %844 = vmatpush.bf16.msrb.mxu3 %v1570_v45  ;;  %v1766_v45 = vld [vmem:[#allocation7 + $0xb4] sm:$0xf]  ;;  %v1363_v16 = vld [vmem:[#allocation7 + $0x8] sm:$0xf0]  ;;  %v1760_v17 = vld [vmem:[#allocation7 + $0x84] sm:$0xf] }
  0x58   :  { %803 = vmatpush.bf16.msrb.mxu0 %v1370_v44  ;;  %v1387_v44 = vld [vmem:[#allocation7 + $0x38] sm:$0xf0]  ;;  %v1454_v48 = vor.u32 %v1766_v45, %v1451_v47  ;;  %v1762_v5 = vld [vmem:[#allocation7 + $0x94] sm:$0xf]  ;;  %v1427_v18 = vld [vmem:[#allocation7 + $0x88] sm:$0xf0] }
  0x59   :  { %817 = vmatpush.bf16.msrb.mxu1 %v1434_v46  ;;  %v1390_v46 = vor.u32 %v1750_v43, %v1387_v44  ;;  %v1430_v20 = vor.u32 %v1760_v17, %v1427_v18  ;;  %v1778_v21 = vld [vmem:[#allocation7 + $0x114] sm:$0xf]  ;;  %v1499_v22 = vld [vmem:[#allocation7 + $0x118] sm:$0xf0]  ;;  %v1776_v29 = vld [vmem:[#allocation7 + $0x104] sm:$0xf] }
  0x5a   :  { %831 = vmatpush.bf16.msrb.mxu2 %v1498_v61  ;;  %v1782_v61 = vld [vmem:[#allocation7 + $0x134] sm:$0xf]  ;;  %v1502_v25 = vor.u32 %v1778_v21, %v1499_v22  ;;  %v1792_v31 = vld [vmem:[#allocation7 + $0x184] sm:$0xf]  ;;  %v1555_v35 = vld [vmem:[#allocation7 + $0x188] sm:$0xf0] }
  0x5b   :  { %845 = vmatpush.bf16.msrb.mxu3 %v1562_v0  ;;  %v1518_v0 = vor.u32 %v1782_v61, %v1515_v62  ;;  %v1558_v37 = vor.u32 %v1792_v31, %v1555_v35  ;;  %v407_v17 = vld [vmem:[#allocation11 + $0x1] ss:$8 sm:$0x3]  ;;  %s1209_s5 = sshll.u32 %s2043_s4, 4  ;;  %s1211_s7 = sshll.u32 %s2114_s6, 4  ;;  %s1210_s5 = int_to_ptr.vmem [resolvable:$true] %s1209_s5  ;;  %s1212_s7 = int_to_ptr.hbm [resolvable:$true] %s1211_s7 }
  0x5c   :  { %804 = vmatpush.bf16.msrb.mxu0 %v1362_v51  ;;  %v1800_v51 = vld [vmem:[#allocation7 + $0x1c4] sm:$0xf] }
  0x5d   :  { %818 = vmatpush.bf16.msrb.mxu1 %v1426_v52  ;;  %v1526_v52 = vor.u32 %v1784_v49, %v1523_v50  ;;  %v1590_v54 = vor.u32 %v1800_v51, %v1587_v53  ;;  %v1816_v22 = vld [vmem:[#allocation8 + $0x40] sm:$0xff] }
  0x5e   :  { %832 = vmatpush.bf16.msrb.mxu2 %v1490_v11  ;;  %v1510_v11 = vor.u32 %v1780_v8, %v1507_v9  ;;  %v1810_v8 = vld [vmem:[#allocation8 + $0x10] sm:$0xff] }
  0x5f   :  { %846 = vmatpush.bf16.msrb.mxu3 %v1554_v12  ;;  %v1796_v12 = vld [vmem:[#allocation7 + $0x1a4] sm:$0xf]  ;;  %v1822_v9 = vld [vmem:[#allocation8 + $0x70] sm:$0xff] }
  0x60   :  { %853 = vmatpush.bf16.msra.mxu0 %v1422_v56  ;;  %v1379_v56 = vld [vmem:[#allocation7 + $0x28] sm:$0xf0] }
  0x61   :  { %867 = vmatpush.bf16.msra.mxu1 %v1486_v60  ;;  %v1382_v58 = vor.u32 %v1748_v55, %v1379_v56  ;;  %v1446_v60 = vor.u32 %v1764_v57, %v1443_v59 }
  0x62   :  { %881 = vmatpush.bf16.msra.mxu2 %v1550_v15  ;;  %v1574_v15 = vor.u32 %v1796_v12, %v1571_v13  ;;  %v1808_v12 = vld [vmem:[#allocation8] sm:$0xff] }
  0x63   :  { %895 = vmatpush.bf16.msra.mxu3 %v1614_v19  ;;  %v1366_v19 = vor.u32 %v1744_v14, %v1363_v16  ;;  %v1820_v13 = vld [vmem:[#allocation8 + $0x60] sm:$0xff]  ;;  %v1819_v14 = vld [vmem:[#allocation8 + $0x58] sm:$0xff]  ;;  %v1818_v16 = vld [vmem:[#allocation8 + $0x50] sm:$0xff] }
  0x64   :  { %854 = vmatpush.bf16.msra.mxu0 %v1414_v3  ;;  %v1746_v3 = vld [vmem:[#allocation7 + $0x14] sm:$0xf] }
  0x65   :  { %868 = vmatpush.bf16.msra.mxu1 %v1478_v7  ;;  %v1374_v6 = vor.u32 %v1746_v3, %v1371_v4  ;;  %v1435_v7 = vld [vmem:[#allocation7 + $0x98] sm:$0xf0]  ;;  %v1814_v3 = vld [vmem:[#allocation8 + $0x30] sm:$0xff]  ;;  %v1813_v4 = vld [vmem:[#allocation8 + $0x28] sm:$0xff] }
  0x66   :  { %882 = vmatpush.bf16.msra.mxu2 %v1542_v27  ;;  %v1438_v10 = vor.u32 %v1762_v5, %v1435_v7  ;;  %v118_v27 = vld [vmem:[#allocation11] ss:$8 sm:$0xf] }
  0x67   :  { %896 = vmatpush.bf16.msra.mxu3 %v1606_v30  ;;  %v1491_v30 = vld [vmem:[#allocation7 + $0x108] sm:$0xf0]  ;;  %v152_v32 = vperm.slane %v118_v27, 0  ;;  %v154_v47 = vperm.slane %v118_v27, 2  ;;  %v155_v49 = vperm.slane %v118_v27, 3  ;;  %v1812_v5 = vld [vmem:[#allocation8 + $0x20] sm:$0xff] }
  0x68   :  { %855 = vmatpush.bf16.msra.mxu0 %v1406_v23  ;;  %v1794_v23 = vld [vmem:[#allocation7 + $0x194] sm:$0xf]  ;;  %v1823_v7 = vld [vmem:[#allocation8 + $0x78] sm:$0xff] }
  0x69   :  { %869 = vmatpush.bf16.msra.mxu1 %v1470_v24  ;;  %v1563_v24 = vld [vmem:[#allocation7 + $0x198] sm:$0xf0] }
  0x6a   :  { %883 = vmatpush.bf16.msra.mxu2 %v1534_v40  ;;  %v1566_v26 = vor.u32 %v1794_v23, %v1563_v24 }
  0x6b   :  { %897 = vmatpush.bf16.msra.mxu3 %v1598_v42 }
  0x6c   :  { %856 = vmatpush.bf16.msra.mxu0 %v1398_v34  ;;  %v1494_v34 = vor.u32 %v1776_v29, %v1491_v30 }
  0x6d   :  { %870 = vmatpush.bf16.msra.mxu1 %v1462_v36  ;;  %v153_v36 = vperm.slane %v118_v27, 1 }
  0x6e   :  { %884 = vmatpush.bf16.msra.mxu2 %v1526_v52  ;;  %v1815_v52 = vld [vmem:[#allocation8 + $0x38] sm:$0xff] }
  0x6f   :  { %898 = vmatpush.bf16.msra.mxu3 %v1590_v54 }
  0x70   :  { %857 = vmatpush.bf16.msra.mxu0 %v1390_v46 }
  0x71   :  { %871 = vmatpush.bf16.msra.mxu1 %v1454_v48 }
  0x72   :  { %885 = vmatpush.bf16.msra.mxu2 %v1518_v0 }
  0x73   :  { %899 = vmatpush.bf16.msra.mxu3 %v1582_v2 }
  0x74   :  { %858 = vmatpush.bf16.msra.mxu0 %v1382_v58 }
  0x75   :  { %872 = vmatpush.bf16.msra.mxu1 %v1446_v60 }
  0x76   :  { %886 = vmatpush.bf16.msra.mxu2 %v1510_v11  ;;  %v1821_v11 = vld [vmem:[#allocation8 + $0x68] sm:$0xff] }
  0x77   :  { %900 = vmatpush.bf16.msra.mxu3 %v1574_v15 }
  0x78   :  { %859 = vmatpush.bf16.msra.mxu0 %v1374_v6  ;;  %v1811_v6 = vld [vmem:[#allocation8 + $0x18] sm:$0xff] }
  0x79   :  { %873 = vmatpush.bf16.msra.mxu1 %v1438_v10  ;;  %v1809_v10 = vld [vmem:[#allocation8 + $0x8] sm:$0xff] }
  0x7a   :  { %887 = vmatpush.bf16.msra.mxu2 %v1502_v25 }
  0x7b   :  { %901 = vmatpush.bf16.msra.mxu3 %v1566_v26 }
  0x7c   :  { %860 = vmatpush.bf16.msra.mxu0 %v1366_v19  ;;  %v1817_v19 = vld [vmem:[#allocation8 + $0x48] sm:$0xff] }
  0x7d   :  { %874 = vmatpush.bf16.msra.mxu1 %v1430_v20  ;;  %v473_v20 = vperm.slane %v407_v17, 0 }
  0x7e   :  { %888 = vmatpush.bf16.msra.mxu2 %v1494_v34 }
  0x7f   :  { %902 = vmatpush.bf16.msra.mxu3 %v1558_v37 }
  0xbc   :  { %v335_v28 = vpop.f32.mrf.mxu0 }
  0xbd   :  { %v349_v33 = vpop.f32.mrf.mxu1  ;;  %v336_v38 = vadd.f32 %v335_v28, %v152_v32 }
  0xbe   :  { %v350_v39 = vadd.f32 %v349_v33, %v153_v36 }
  0xbf   :  { %v394_v43 = vmax.f32 %v336_v38, 0.0 }
  0xc0   :  { %v395_v46 = vmax.f32 %v350_v39, 0.0 }
  0xc4   :  { %v363_v40 = vpop.f32.mrf.mxu2  ;;  %v337_v42 = vpop.f32.mrf.mxu0 }
  0xc5   :  { %v377_v41 = vpop.f32.mrf.mxu3  ;;  %v338_v44 = vadd.f32 %v337_v42, %v152_v32  ;;  %v351_v45 = vpop.f32.mrf.mxu1  ;;  %v364_v54 = vadd.f32 %v363_v40, %v154_v47 }
  0xc6   :  { %v352_v48 = vadd.f32 %v351_v45, %v153_v36  ;;  %v378_v56 = vadd.f32 %v377_v41, %v155_v49  ;;  %v474_v36 = vperm.slane %v407_v17, 1 }
  0xc7   :  { %v398_v50 = vmax.f32 %v338_v44, 0.0  ;;  %v396_v61 = vmax.f32 %v364_v54, 0.0 }
  0xc8   :  { %v399_v51 = vmax.f32 %v352_v48, 0.0  ;;  %v397_v63 = vmax.f32 %v378_v56, 0.0 }
  0xc9   :  { %v402_v53 = vpack.c.bf16 %v398_v50, %v394_v43 }
  0xca   :  { %v403_v55 = vpack.c.bf16 %v399_v51, %v395_v46 }
  0xcb   :  { %805 = vmatmul.bf16.vlgmr.msrb.gmra.mxu0 %v402_v53 }
  0xcc   :  { %v365_v57 = vpop.f32.mrf.mxu2  ;;  %819 = vmatmul.bf16.vlgmr.msrb.gmra.mxu1 %v403_v55  ;;  %1050 = vmatpush.bf16.msrb.mxu0 %v1815_v52 }
  0xcd   :  { %v366_v58 = vadd.f32 %v365_v57, %v154_v47  ;;  %v379_v59 = vpop.f32.mrf.mxu3  ;;  %1064 = vmatpush.bf16.msrb.mxu1 %v1823_v7 }
  0xce   :  { %v380_v60 = vadd.f32 %v379_v59, %v155_v49  ;;  %v1831_v59 = vld [vmem:[#allocation10 + $0x38] sm:$0xff] }
  0xcf   :  { %v400_v62 = vmax.f32 %v366_v58, 0.0 }
  0xd0   :  { %v401_v0 = vmax.f32 %v380_v60, 0.0  ;;  %1051 = vmatpush.bf16.msrb.mxu0 %v1814_v3  ;;  %v1830_v60 = vld [vmem:[#allocation10 + $0x30] sm:$0xff] }
  0xd1   :  { %v404_v1 = vpack.c.bf16 %v400_v62, %v396_v61  ;;  %1065 = vmatpush.bf16.msrb.mxu1 %v1822_v9  ;;  %v1829_v61 = vld [vmem:[#allocation10 + $0x28] sm:$0xff]  ;;  %v1828_v62 = vld [vmem:[#allocation10 + $0x20] sm:$0xff] }
  0xd2   :  { %v405_v2 = vpack.c.bf16 %v401_v0, %v397_v63  ;;  %v1827_v63 = vld [vmem:[#allocation10 + $0x18] sm:$0xff]  ;;  %v1826_v0 = vld [vmem:[#allocation10 + $0x10] sm:$0xff] }
  0xd3   :  { %833 = vmatmul.bf16.vlgmr.msrb.gmra.mxu2 %v404_v1 }
  0xd4   :  { %847 = vmatmul.bf16.vlgmr.msrb.gmra.mxu3 %v405_v2  ;;  %1052 = vmatpush.bf16.msrb.mxu0 %v1813_v4 }
  0xd5   :  { %1066 = vmatpush.bf16.msrb.mxu1 %v1821_v11  ;;  %1150 = vmatpush.bf16.msrb.mxu2 %v1831_v59 }
  0xd8   :  { %1053 = vmatpush.bf16.msrb.mxu0 %v1812_v5  ;;  %v921_v5 = vld [vmem:[#allocation11 + $0x2] ss:$0 sm:$0xff] }
  0xd9   :  { %1067 = vmatpush.bf16.msrb.mxu1 %v1820_v13  ;;  %1151 = vmatpush.bf16.msrb.mxu2 %v1830_v60 }
  0xdb   :  { %861 = vmatmul.bf16.vlgmr.msra.gmra.mxu0 %v402_v53 }
  0xdc   :  { %875 = vmatmul.bf16.vlgmr.msra.gmra.mxu1 %v403_v55  ;;  %1054 = vmatpush.bf16.msrb.mxu0 %v1811_v6 }
  0xdd   :  { %1068 = vmatpush.bf16.msrb.mxu1 %v1819_v14  ;;  %1152 = vmatpush.bf16.msrb.mxu2 %v1829_v61 }
  0xe0   :  { %1055 = vmatpush.bf16.msrb.mxu0 %v1810_v8 }
  0xe1   :  { %1069 = vmatpush.bf16.msrb.mxu1 %v1818_v16  ;;  %1153 = vmatpush.bf16.msrb.mxu2 %v1828_v62 }
  0xe3   :  { %889 = vmatmul.bf16.vlgmr.msra.gmra.mxu2 %v404_v1  ;;  %v1825_v1 = vld [vmem:[#allocation10 + $0x8] sm:$0xff] }
  0xe4   :  { %903 = vmatmul.bf16.vlgmr.msra.gmra.mxu3 %v405_v2  ;;  %1056 = vmatpush.bf16.msrb.mxu0 %v1809_v10  ;;  %v1824_v2 = vld [vmem:[#allocation10] sm:$0xff] }
  0xe5   :  { %1070 = vmatpush.bf16.msrb.mxu1 %v1817_v19  ;;  %1154 = vmatpush.bf16.msrb.mxu2 %v1827_v63 }
  0xe8   :  { %1057 = vmatpush.bf16.msrb.mxu0 %v1808_v12 }
  0xe9   :  { %1071 = vmatpush.bf16.msrb.mxu1 %v1816_v22  ;;  %1155 = vmatpush.bf16.msrb.mxu2 %v1826_v0 }
  0xed   :  { %1156 = vmatpush.bf16.msrb.mxu2 %v1825_v1 }
  0xf1   :  { %1157 = vmatpush.bf16.msrb.mxu2 %v1824_v2 }
 0x148   :  { %v806_v15 = vpop.f32.mrf.mxu0 }
 0x149   :  { %v820_v18 = vpop.f32.mrf.mxu1  ;;  %v807_v23 = vadd.f32 %v806_v15, %v473_v20  ;;  %v1085_v15 = vld [vmem:[#allocation11 + $0x3] ss:$0 sm:$0xff] }
 0x14b   :  { %v821_v27 = vadd.f32 %v820_v18, %v807_v23 }
 0x150   :  { %v808_v21 = vpop.f32.mrf.mxu0 }
 0x151   :  { %v822_v26 = vpop.f32.mrf.mxu1  ;;  %v809_v28 = vadd.f32 %v808_v21, %v473_v20 }
 0x153   :  { %v823_v31 = vadd.f32 %v822_v26, %v809_v28 }
 0x156   :  { %v834_v24 = vpop.f32.mrf.mxu2 }
 0x157   :  { %v848_v25 = vpop.f32.mrf.mxu3  ;;  %v835_v29 = vadd.f32 %v834_v24, %v821_v27 }
 0x158   :  { %v862_v30 = vpop.f32.mrf.mxu0 }
 0x159   :  { %v849_v33 = vadd.f32 %v848_v25, %v835_v29  ;;  %v876_v38 = vpop.f32.mrf.mxu1  ;;  %v863_v41 = vadd.f32 %v862_v30, %v474_v36  ;;  %v1164_v29 = vlaneseq }
 0x15b   :  { %v915_v39 = vmax.f32 %v849_v33, 0.0  ;;  %v877_v46 = vadd.f32 %v876_v38, %v863_v41 }
 0x15e   :  { %v836_v32 = vpop.f32.mrf.mxu2 }
 0x15f   :  { %v837_v34 = vadd.f32 %v836_v32, %v823_v31  ;;  %v850_v35 = vpop.f32.mrf.mxu3 }
 0x160   :  { %v864_v43 = vpop.f32.mrf.mxu0 }
 0x161   :  { %v851_v37 = vadd.f32 %v850_v35, %v837_v34  ;;  %v865_v47 = vadd.f32 %v864_v43, %v474_v36  ;;  %v878_v49 = vpop.f32.mrf.mxu1  ;;  %v1165_v35 = vand.u32 127, %v1164_v29 }
 0x163   :  { %v917_v40 = vmax.f32 %v851_v37, 0.0  ;;  %v879_v50 = vadd.f32 %v878_v49, %v865_v47  ;;  %vm1166_vm1 = vcmp.lt.s32.totalorder %v1165_v35, 2 }
 0x165   :  { %v919_v42 = vpack.c.bf16 %v917_v40, %v915_v39 }
 0x166   :  { %v890_v44 = vpop.f32.mrf.mxu2 }
 0x167   :  { %v904_v45 = vpop.f32.mrf.mxu3  ;;  %1058 = vmatmul.bf16.vlgmr.msrb.gmra.mxu0 %v919_v42  ;;  %v891_v48 = vadd.f32 %v890_v44, %v877_v46 }
 0x169   :  { %v905_v52 = vadd.f32 %v904_v45, %v891_v48 }
 0x16b   :  { %v916_v56 = vmax.f32 %v905_v52, 0.0 }
 0x16e   :  { %v892_v51 = vpop.f32.mrf.mxu2 }
 0x16f   :  { %v893_v53 = vadd.f32 %v892_v51, %v879_v50  ;;  %v906_v54 = vpop.f32.mrf.mxu3 }
 0x171   :  { %v907_v55 = vadd.f32 %v906_v54, %v893_v53 }
 0x173   :  { %v918_v57 = vmax.f32 %v907_v55, 0.0 }
 0x175   :  { %v920_v58 = vpack.c.bf16 %v918_v57, %v916_v56 }
 0x177   :  { %1072 = vmatmul.bf16.vlgmr.msrb.gmra.mxu1 %v920_v58 }
 0x1e4   :  { %v1059_v3 = vpop.f32.mrf.mxu0 }
 0x1e5   :  { %v1060_v7 = vadd.f32 %v1059_v3, %v921_v5 }
 0x1ec   :  { %v1061_v6 = vpop.f32.mrf.mxu0 }
 0x1ed   :  { %v1062_v8 = vadd.f32 %v1061_v6, %v921_v5 }
 0x1f4   :  { %v1073_v4 = vpop.f32.mrf.mxu1 }
 0x1f5   :  { %v1074_v9 = vadd.f32 %v1073_v4, %v1060_v7 }
 0x1f7   :  { %v1082_v12 = vmax.f32 %v1074_v9, 0.0 }
 0x1fc   :  { %v1075_v10 = vpop.f32.mrf.mxu1 }
 0x1fd   :  { %v1076_v11 = vadd.f32 %v1075_v10, %v1062_v8 }
 0x1ff   :  { %v1083_v13 = vmax.f32 %v1076_v11, 0.0 }
 0x201   :  { %v1084_v14 = vpack.c.bf16 %v1083_v13, %v1082_v12 }
 0x203   :  { %1158 = vmatmul.bf16.vlgmr.msrb.gmra.mxu2 %v1084_v14 }
 0x286   :  { %v1159_v16 = vpop.f32.mrf.mxu2 }
 0x287   :  { %v1160_v17 = vadd.f32 %v1159_v16, %v1085_v15 }
 0x289   :  { %v1169_v18 = vand.u32 2147483647, %v1160_v17  ;;  %v1167_v39 = vmax.f32 %v1160_v17, 0.0 }
 0x28b   :  { %v1171_v19 = vsub.f32 0.0, %v1169_v18 }
 0x28d   :  { %v1173_v20 = vmul.f32 1.442695, %v1171_v19 }
 0x28e   :  { %v1161_v21 = vpop.f32.mrf.mxu2 }
 0x28f   :  { %1845 = vpow2.f32 %v1173_v20  ;;  %v1162_v22 = vadd.f32 %v1161_v21, %v1085_v15 }
 0x291   :  { %v1170_v23 = vand.u32 2147483647, %v1162_v22  ;;  %v1168_v49 = vmax.f32 %v1162_v22, 0.0 }
 0x293   :  { %v1172_v24 = vsub.f32 0.0, %v1170_v23 }
 0x295   :  { %v1846_v25 = vpop.eup %1845  ;;  %v1175_v26 = vmul.f32 1.442695, %v1172_v24 }
 0x296   :  { %v1177_v27 = vadd.f32 1.0, %v1846_v25  ;;  %v1180_v28 = vmul.f32 -0.5, %v1846_v25  ;;  %v1183_v31 = vand.u32 2147483647, %v1846_v25 }
 0x297   :  { %1847 = vpow2.f32 %v1175_v26 }
 0x298   :  { %1849 = vlog2.f32 %v1177_v27  ;;  %v1181_v30 = vadd.f32 1.0, %v1180_v28  ;;  %vm1184_vm0 = vcmp.lt.f32.partialorder %v1183_v31, 0.0004427343 }
 0x29a   :  { %v1182_v37 = vmul.f32 %v1846_v25, %v1181_v30 }
 0x29d   :  { %v1848_v32 = vpop.eup %1847 }
 0x29e   :  { %v1850_v33 = vpop.eup %1849  ;;  %v1186_v34 = vadd.f32 1.0, %v1848_v32  ;;  %v1189_v38 = vmul.f32 -0.5, %v1848_v32  ;;  %v1192_v44 = vand.u32 2147483647, %v1848_v32 }
 0x29f   :  { %v1179_v36 = vmul.f32 0.6931472, %v1850_v33 }
 0x2a0   :  { %1851 = vlog2.f32 %v1186_v34  ;;  %v1190_v42 = vadd.f32 1.0, %v1189_v38  ;;  %vm1193_vm2 = vcmp.lt.f32.partialorder %v1192_v44, 0.0004427343 }
 0x2a1   :  { %v1185_v40 = vsel %vm1184_vm0, %v1182_v37, %v1179_v36 }
 0x2a2   :  { %v1195_v41 = vadd.f32 %v1185_v40, %v1167_v39  ;;  %v1191_v48 = vmul.f32 %v1848_v32, %v1190_v42 }
 0x2a4   :  { %v1197_v43 = vadd.f32 1.0, %v1195_v41 }
 0x2a6   :  { %v1852_v45 = vpop.eup %1851  ;;  %v1201_v46 = vsel %vm1166_vm1, %v1197_v43, %v1160_v17 }
 0x2a7   :  { %1203 = vst [vmem:[#allocation13] sm:$0xff] %v1201_v46  ;;  %v1188_v47 = vmul.f32 0.6931472, %v1852_v45 }
 0x2a9   :  { %v1194_v50 = vsel %vm1193_vm2, %v1191_v48, %v1188_v47 }
 0x2aa   :  { %v1196_v51 = vadd.f32 %v1194_v50, %v1168_v49 }
 0x2ac   :  { %v1198_v52 = vadd.f32 1.0, %v1196_v51 }
 0x2ae   :  { %v1202_v53 = vsel %vm1166_vm1, %v1198_v52, %v1162_v22 }
 0x2af   :  { %1204 = vst [vmem:[#allocation13 + $0x8] sm:$0xff] %v1202_v53 }
 0x2b0   :  { %1217 = dma.vmem_to_hbm [thread:$0]  %s1210_s5, 256, %s1212_s7, [#allocation4], %s2039_s19, %s2039_s19, %s2040_s20  }
 0x2b1   :  { %2029 = dma.done.wait [#allocation4], 256  }
 0x2b2   :  { %2030 = vsyncadd [#allocation4], 4294967040 }
 0x2b3   :  { %1222 = vsyncpa [#allocation3], 1 }
 0x2b4   :  { %1223 = vsyncpa [#allocation6], 1 }
 0x2b5   :  { %1224 = vsyncpa [#allocation9], 1 }
 0x2b6   :  { %1225 = vsyncpa [#allocation12], 1 }
 0x2b7   :  { %1226 = vsyncpa [#allocation4], 1 }

</bundles_post_ra>
